<compile_context>
chip_gen: v6e
topology: v6e:2x2x1
jax: 0.10.0
libtpu: 0.0.40
codegen_flags: <defaults>
</compile_context>

<pallas_src>
import functools
import math

import jax
import jax.numpy as jnp
from jax.experimental import pallas as pl
from jax.experimental.pallas import tpu as pltpu


def policy_kernel(
    x_ref,                      # (B, D_in)      f32
    w1_ref, b1_ref,             # (D_in, 256) bf16, (1, 256) f32
    w2_ref, b2_ref,             # (256, 256)  bf16, (1, 256) f32
    wh_ref, bh_ref,             # (256, A+2)  bf16, (1, A+2) f32  (fused click+coord heads)
    u_ref,                      # (B, 8) f32 uniforms in (0,1): [:, :A] gumbel, [:, A:A+2] noise
    out_ref,                    # (B, 8) f32 packed: [action, lpc, coord_x, coord_y, lpk, total, 0, 0]
    *,
    num_click_actions: int,
    action_std: float,
    screen_size: int,
):
    A = num_click_actions
    x = x_ref[...]
    B = x.shape[0]

    # --- MLP trunk: fc1 -> relu -> fc2 -> relu (bf16 MXU, f32 accumulate) ----
    h1 = jnp.dot(x.astype(jnp.bfloat16), w1_ref[...],
                 preferred_element_type=jnp.float32) + b1_ref[...]
    h1 = jnp.maximum(h1, 0.0)
    h2 = jnp.dot(h1.astype(jnp.bfloat16), w2_ref[...],
                 preferred_element_type=jnp.float32) + b2_ref[...]
    h2 = jnp.maximum(h2, 0.0)

    # --- fused heads: one matmul gives click logits and raw coord means ------
    heads = jnp.dot(h2.astype(jnp.bfloat16), wh_ref[...],
                    preferred_element_type=jnp.float32) + bh_ref[...]
    logits = heads[:, :A]                 # (B, A)
    cm = heads[:, A:A + 2]                # (B, 2)

    # --- click head: stable log-softmax + Gumbel-max categorical sample ------
    m = jnp.max(logits, axis=1, keepdims=True)
    shifted = logits - m
    log_probs = shifted - jnp.log(jnp.sum(jnp.exp(shifted), axis=1,
                                          keepdims=True))   # (B, A)

    u_cat = u_ref[:, :A]                              # uniforms in (0, 1)
    gumbel = -jnp.log(-jnp.log(u_cat))
    z = logits + gumbel
    zmax = jnp.max(z, axis=1, keepdims=True)
    col_idx = jax.lax.broadcasted_iota(jnp.int32, (B, A), 1)
    # first index attaining the max (argmax via masked lane-min of indices)
    action_f = jnp.min(
        jnp.where(z >= zmax, col_idx.astype(jnp.float32), jnp.float32(A)),
        axis=1, keepdims=True)                        # (B, 1) f32, exact small ints
    action_i = action_f.astype(jnp.int32)
    lpc = jnp.sum(jnp.where(col_idx == action_i, log_probs, 0.0),
                  axis=1, keepdims=True)              # (B, 1)

    # --- coord head: sigmoid * screen + uniform noise (matches torch module) -
    coord_mean = jax.nn.sigmoid(cm) * jnp.float32(screen_size)             # (B, 2)
    u_noise = u_ref[:, A:A + 2]
    noise = (u_noise * 2.0 - 1.0) * jnp.float32(action_std)                # U(-std, std)
    coords = coord_mean + noise

    # coords - coord_mean == noise, so compute the log-prob from noise directly;
    # fold 1/(2*var) and log_scale into compile-time constants (multiply, no div).
    var = action_std ** 2 / 3.0
    neg_inv_two_var = -1.0 / (2.0 * var)
    log_scale = math.log(action_std * 2.0 * math.sqrt(3.0))
    lpk = jnp.sum(noise * noise * jnp.float32(neg_inv_two_var)
                  - jnp.float32(log_scale),
                  axis=1, keepdims=True)              # (B, 1)

    total = lpc + lpk
    pad = jnp.zeros((B, 2), jnp.float32)
    # single lane-packed output store (one write-back DMA)
    out_ref[...] = jnp.concatenate([action_f, lpc, coords, lpk, total, pad], axis=1)


def policy_forward(x, params, uniforms, *, action_std, screen_size):
    B = x.shape[0]
    A = params["bh"].shape[1] - 2

    kernel = functools.partial(
        policy_kernel,
        num_click_actions=A,
        action_std=action_std,
        screen_size=screen_size,
    )

    vmem = pl.BlockSpec(memory_space=pltpu.MemorySpace.VMEM)

    fn = pl.pallas_call(
        kernel,
        out_shape=jax.ShapeDtypeStruct((B, 8), jnp.float32),
        in_specs=[vmem] * 8,
        out_specs=vmem,
    )

    packed = fn(
        x,
        params["w1"], params["b1"],
        params["w2"], params["b2"],
        params["wh"], params["bh"],
        uniforms,
    )

    click_action = packed[:, 0].astype(jnp.int32)     # (B,)
    log_prob_click = packed[:, 1]                     # (B,)
    coords = packed[:, 2:4]                           # (B, 2)
    log_prob_coord = packed[:, 4]                     # (B,)
    total_log_prob = packed[:, 5]                     # (B,)
    return click_action, log_prob_click, coords, log_prob_coord, total_log_prob


def init_params(key, input_dim, hidden, num_click_actions):
    """Deterministic synthetic init; weights stored as (in, out).

    fc_click / fc_coord are fused into a single head weight (hidden, A+2);
    matmul weights are shipped in bf16, biases kept in f32.
    """
    ks = jax.random.split(key, 8)

    def lin(kw, kb, fan_in, fan_out):
        bound = 1.0 / math.sqrt(fan_in)
        w = jax.random.uniform(kw, (fan_in, fan_out), jnp.float32, -bound, bound)
        b = jax.random.uniform(kb, (1, fan_out), jnp.float32, -bound, bound)
        return w, b

    w1, b1 = lin(ks[0], ks[1], input_dim, hidden)
    w2, b2 = lin(ks[2], ks[3], hidden, hidden)
    wc, bc = lin(ks[4], ks[5], hidden, num_click_actions)
    wk, bk = lin(ks[6], ks[7], hidden, 2)

    wh = jnp.concatenate([wc, wk], axis=1)            # (hidden, A+2)
    bh = jnp.concatenate([bc, bk], axis=1)            # (1, A+2)

    return {
        "w1": w1.astype(jnp.bfloat16), "b1": b1,
        "w2": w2.astype(jnp.bfloat16), "b2": b2,
        "wh": wh.astype(jnp.bfloat16), "bh": bh,
    }


if __name__ == "__main__":
    B = 8
    INPUT_DIM = 32
    HIDDEN = 256                 # fixed by the module definition
    NUM_CLICK_ACTIONS = 4
    ACTION_STD = 0.5
    SCREEN_SIZE = 16

    key = jax.random.PRNGKey(0)
    kx, kp, ku = jax.random.split(key, 3)
    x = jax.random.normal(kx, (B, INPUT_DIM), dtype=jnp.float32)
    params = init_params(kp, INPUT_DIM, HIDDEN, NUM_CLICK_ACTIONS)
    # one uniform draw feeding both the Gumbel-max sample and the coord noise
    uniforms = jax.random.uniform(ku, (B, 8), jnp.float32,
                                  minval=1e-7, maxval=1.0 - 1e-7)

    outs = policy_forward(
        x, params, uniforms, action_std=ACTION_STD, screen_size=SCREEN_SIZE
    )
    outs = jax.block_until_ready(outs)

    click_action, log_prob_click, coords, log_prob_coord, total_log_prob = outs
    assert click_action.shape == (B,)
    assert log_prob_click.shape == (B,)
    assert coords.shape == (B, 2)
    assert log_prob_coord.shape == (B,)
    assert total_log_prob.shape == (B,)
    assert bool(jnp.all(click_action >= 0)) and bool(
        jnp.all(click_action < NUM_CLICK_ACTIONS)
    )
    assert bool(jnp.all(log_prob_click <= 0.0))
    assert bool(jnp.all(jnp.isfinite(log_prob_click)))
    assert bool(jnp.all(jnp.isfinite(coords)))
    assert bool(jnp.all(coords >= -ACTION_STD))
    assert bool(jnp.all(coords <= SCREEN_SIZE + ACTION_STD))
    assert bool(jnp.all(jnp.isfinite(total_log_prob)))
    assert bool(jnp.allclose(total_log_prob, log_prob_click + log_prob_coord,
                             atol=1e-5))

    print("KERNEL_OK")
</pallas_src>

<mosaic_0001>
module attributes {stable_mosaic.version = 11 : i64} {
  func.func @policy_kernel(%arg0: memref<8x32xf32, #tpu.memory_space<vmem>>, %arg1: memref<32x256xbf16, #tpu.memory_space<vmem>>, %arg2: memref<1x256xf32, #tpu.memory_space<vmem>>, %arg3: memref<256x256xbf16, #tpu.memory_space<vmem>>, %arg4: memref<1x256xf32, #tpu.memory_space<vmem>>, %arg5: memref<256x6xbf16, #tpu.memory_space<vmem>>, %arg6: memref<1x6xf32, #tpu.memory_space<vmem>>, %arg7: memref<8x8xf32, #tpu.memory_space<vmem>>, %arg8: memref<8x8xf32, #tpu.memory_space<vmem>>) attributes {dimension_semantics = [], scalar_prefetch = 0 : i64, scratch_operands = 0 : i64, tpu.core_type = #tpu.core_type<tc>} {
    %c0 = arith.constant 0 : index
    %c0_0 = arith.constant 0 : index
    %0 = vector.load %arg0[%c0, %c0_0] : memref<8x32xf32, #tpu.memory_space<vmem>>, vector<8x32xf32>
    %1 = arith.truncf %0 : vector<8x32xf32> to vector<8x32xbf16>
    %c0_1 = arith.constant 0 : index
    %c0_2 = arith.constant 0 : index
    %2 = vector.load %arg1[%c0_1, %c0_2] : memref<32x256xbf16, #tpu.memory_space<vmem>>, vector<32x256xbf16>
    %cst = arith.constant dense<0.000000e+00> : vector<8x256xf32>
    %3 = tpu.matmul %1, %2, %cst {dimension_numbers = #tpu.dot_dimension_numbers<[1], [0], [0], [1], [0, 0, 1, 1], [], []>} : vector<8x32xbf16>, vector<32x256xbf16>, vector<8x256xf32> -> vector<8x256xf32>
    %c0_3 = arith.constant 0 : index
    %c0_4 = arith.constant 0 : index
    %4 = vector.load %arg2[%c0_3, %c0_4] : memref<1x256xf32, #tpu.memory_space<vmem>>, vector<1x256xf32>
    %5 = vector.broadcast %4 : vector<1x256xf32> to vector<8x256xf32>
    %6 = arith.addf %3, %5 : vector<8x256xf32>
    %cst_5 = arith.constant 0.000000e+00 : f32
    %7 = vector.broadcast %cst_5 : f32 to vector<8x256xf32>
    %8 = arith.maximumf %6, %7 : vector<8x256xf32>
    %9 = arith.truncf %8 : vector<8x256xf32> to vector<8x256xbf16>
    %c0_6 = arith.constant 0 : index
    %c0_7 = arith.constant 0 : index
    %10 = vector.load %arg3[%c0_6, %c0_7] : memref<256x256xbf16, #tpu.memory_space<vmem>>, vector<256x256xbf16>
    %cst_8 = arith.constant dense<0.000000e+00> : vector<8x256xf32>
    %11 = tpu.matmul %9, %10, %cst_8 {dimension_numbers = #tpu.dot_dimension_numbers<[1], [0], [0], [1], [0, 0, 1, 1], [], []>} : vector<8x256xbf16>, vector<256x256xbf16>, vector<8x256xf32> -> vector<8x256xf32>
    %c0_9 = arith.constant 0 : index
    %c0_10 = arith.constant 0 : index
    %12 = vector.load %arg4[%c0_9, %c0_10] : memref<1x256xf32, #tpu.memory_space<vmem>>, vector<1x256xf32>
    %13 = vector.broadcast %12 : vector<1x256xf32> to vector<8x256xf32>
    %14 = arith.addf %11, %13 : vector<8x256xf32>
    %cst_11 = arith.constant 0.000000e+00 : f32
    %15 = vector.broadcast %cst_11 : f32 to vector<8x256xf32>
    %16 = arith.maximumf %14, %15 : vector<8x256xf32>
    %17 = arith.truncf %16 : vector<8x256xf32> to vector<8x256xbf16>
    %c0_12 = arith.constant 0 : index
    %c0_13 = arith.constant 0 : index
    %18 = vector.load %arg5[%c0_12, %c0_13] : memref<256x6xbf16, #tpu.memory_space<vmem>>, vector<256x6xbf16>
    %cst_14 = arith.constant dense<0.000000e+00> : vector<8x6xf32>
    %19 = tpu.matmul %17, %18, %cst_14 {dimension_numbers = #tpu.dot_dimension_numbers<[1], [0], [0], [1], [0, 0, 1, 1], [], []>} : vector<8x256xbf16>, vector<256x6xbf16>, vector<8x6xf32> -> vector<8x6xf32>
    %c0_15 = arith.constant 0 : index
    %c0_16 = arith.constant 0 : index
    %20 = vector.load %arg6[%c0_15, %c0_16] : memref<1x6xf32, #tpu.memory_space<vmem>>, vector<1x6xf32>
    %21 = vector.broadcast %20 : vector<1x6xf32> to vector<8x6xf32>
    %22 = arith.addf %19, %21 : vector<8x6xf32>
    %23 = vector.extract_strided_slice %22 {offsets = [0, 0], sizes = [8, 4], strides = [1, 1]} : vector<8x6xf32> to vector<8x4xf32>
    %24 = vector.extract_strided_slice %22 {offsets = [0, 4], sizes = [8, 2], strides = [1, 1]} : vector<8x6xf32> to vector<8x2xf32>
    %cst_17 = arith.constant dense<0xFF800000> : vector<8xf32>
    %25 = vector.multi_reduction <maximumf>, %23, %cst_17 [1] : vector<8x4xf32> to vector<8xf32>
    %26 = vector.shape_cast %25 : vector<8xf32> to vector<8x1xf32>
    %27 = vector.broadcast %26 : vector<8x1xf32> to vector<8x4xf32>
    %28 = arith.subf %23, %27 : vector<8x4xf32>
    %29 = math.exp %28 : vector<8x4xf32>
    %cst_18 = arith.constant dense<0.000000e+00> : vector<8xf32>
    %30 = vector.multi_reduction <add>, %29, %cst_18 [1] : vector<8x4xf32> to vector<8xf32>
    %31 = vector.shape_cast %30 : vector<8xf32> to vector<8x1xf32>
    %32 = math.log %31 : vector<8x1xf32>
    %33 = vector.broadcast %32 : vector<8x1xf32> to vector<8x4xf32>
    %34 = arith.subf %28, %33 : vector<8x4xf32>
    %c0_19 = arith.constant 0 : index
    %c0_20 = arith.constant 0 : index
    %35 = vector.load %arg7[%c0_19, %c0_20] : memref<8x8xf32, #tpu.memory_space<vmem>>, vector<8x4xf32>
    %36 = math.log %35 : vector<8x4xf32>
    %cst_21 = arith.constant 0.000000e+00 : f32
    %37 = vector.broadcast %cst_21 : f32 to vector<8x4xf32>
    %38 = arith.subf %37, %36 : vector<8x4xf32>
    %39 = math.log %38 : vector<8x4xf32>
    %cst_22 = arith.constant 0.000000e+00 : f32
    %40 = vector.broadcast %cst_22 : f32 to vector<8x4xf32>
    %41 = arith.subf %40, %39 : vector<8x4xf32>
    %42 = arith.addf %23, %41 : vector<8x4xf32>
    %cst_23 = arith.constant dense<0xFF800000> : vector<8xf32>
    %43 = vector.multi_reduction <maximumf>, %42, %cst_23 [1] : vector<8x4xf32> to vector<8xf32>
    %44 = vector.shape_cast %43 : vector<8xf32> to vector<8x1xf32>
    %45 = tpu.iota {dimensions = array<i32: 1>} : vector<8x4xi32>
    %46 = vector.broadcast %44 : vector<8x1xf32> to vector<8x4xf32>
    %47 = arith.cmpf oge, %42, %46 : vector<8x4xf32>
    %48 = arith.sitofp %45 : vector<8x4xi32> to vector<8x4xf32>
    %cst_24 = arith.constant 4.000000e+00 : f32
    %49 = vector.broadcast %cst_24 : f32 to vector<8x4xf32>
    %50 = arith.select %47, %48, %49 : vector<8x4xi1>, vector<8x4xf32>
    %cst_25 = arith.constant dense<0x7F800000> : vector<8xf32>
    %51 = vector.multi_reduction <minimumf>, %50, %cst_25 [1] : vector<8x4xf32> to vector<8xf32>
    %52 = vector.shape_cast %51 : vector<8xf32> to vector<8x1xf32>
    %53 = arith.fptosi %52 : vector<8x1xf32> to vector<8x1xi32>
    %54 = vector.broadcast %53 : vector<8x1xi32> to vector<8x4xi32>
    %55 = arith.cmpi eq, %45, %54 : vector<8x4xi32>
    %cst_26 = arith.constant 0.000000e+00 : f32
    %56 = vector.broadcast %cst_26 : f32 to vector<8x4xf32>
    %57 = arith.select %55, %34, %56 : vector<8x4xi1>, vector<8x4xf32>
    %cst_27 = arith.constant dense<0.000000e+00> : vector<8xf32>
    %58 = vector.multi_reduction <add>, %57, %cst_27 [1] : vector<8x4xf32> to vector<8xf32>
    %59 = vector.shape_cast %58 : vector<8xf32> to vector<8x1xf32>
    %60 = arith.negf %24 : vector<8x2xf32>
    %61 = math.exp %60 : vector<8x2xf32>
    %cst_28 = arith.constant 1.000000e+00 : f32
    %62 = vector.broadcast %cst_28 : f32 to vector<8x2xf32>
    %63 = arith.addf %62, %61 : vector<8x2xf32>
    %64 = arith.divf %62, %63 : vector<8x2xf32>
    %cst_29 = arith.constant 1.600000e+01 : f32
    %65 = vector.broadcast %cst_29 : f32 to vector<8x2xf32>
    %66 = arith.mulf %64, %65 : vector<8x2xf32>
    %c0_30 = arith.constant 0 : index
    %c4 = arith.constant 4 : index
    %67 = vector.load %arg7[%c0_30, %c4] : memref<8x8xf32, #tpu.memory_space<vmem>>, vector<8x2xf32>
    %cst_31 = arith.constant 2.000000e+00 : f32
    %68 = vector.broadcast %cst_31 : f32 to vector<8x2xf32>
    %69 = arith.mulf %67, %68 : vector<8x2xf32>
    %cst_32 = arith.constant 1.000000e+00 : f32
    %70 = vector.broadcast %cst_32 : f32 to vector<8x2xf32>
    %71 = arith.subf %69, %70 : vector<8x2xf32>
    %cst_33 = arith.constant 5.000000e-01 : f32
    %72 = vector.broadcast %cst_33 : f32 to vector<8x2xf32>
    %73 = arith.mulf %71, %72 : vector<8x2xf32>
    %74 = arith.addf %66, %73 : vector<8x2xf32>
    %75 = arith.mulf %73, %73 : vector<8x2xf32>
    %cst_34 = arith.constant -6.000000e+00 : f32
    %76 = vector.broadcast %cst_34 : f32 to vector<8x2xf32>
    %77 = arith.mulf %75, %76 : vector<8x2xf32>
    %cst_35 = arith.constant 0.549306154 : f32
    %78 = vector.broadcast %cst_35 : f32 to vector<8x2xf32>
    %79 = arith.subf %77, %78 : vector<8x2xf32>
    %cst_36 = arith.constant dense<0.000000e+00> : vector<8xf32>
    %80 = vector.multi_reduction <add>, %79, %cst_36 [1] : vector<8x2xf32> to vector<8xf32>
    %81 = vector.shape_cast %80 : vector<8xf32> to vector<8x1xf32>
    %82 = arith.addf %59, %81 : vector<8x1xf32>
    %cst_37 = arith.constant 0.000000e+00 : f32
    %83 = vector.broadcast %cst_37 : f32 to vector<8x2xf32>
    %84 = tpu.concatenate %52, %59, %74, %81, %82, %83 in 1 : vector<8x1xf32>, vector<8x1xf32>, vector<8x2xf32>, vector<8x1xf32>, vector<8x1xf32>, vector<8x2xf32> -> vector<8x8xf32>
    %c0_38 = arith.constant 0 : index
    %c0_39 = arith.constant 0 : index
    %85 = vector.load %arg8[%c0_38, %c0_39] : memref<8x8xf32, #tpu.memory_space<vmem>>, vector<8x8xf32>
    tpu.vector_store %arg8[%c0_38, %c0_39], %84 {strides = array<i32>} : memref<8x8xf32, #tpu.memory_space<vmem>>, vector<8x8xf32>,
    return
  }
}

</mosaic_0001>

<bundles_post_ra>
// kernel: tpu_custom_call.1
= control target key start
LH: loop header
LB: loop body
LE: loop exit
PB: predicated region body
PF: predicated region fallthrough
CT: control target
= control target key end

     0   :  { %13 = vsyncpa [#allocation3], 0  ;;  %s1003_s0 = inlined_call_operand.vmem [shape: f32[8,32], index: 0, kind: input, shape index: {}]   ;;  %s1004_s1 = inlined_call_operand.vmem [shape: bf16[32,256], index: 1, kind: input, shape index: {}]   ;;  %s1005_s2 = inlined_call_operand.vmem [shape: f32[1,256], index: 2, kind: input, shape index: {}]   ;;  %s1006_s3 = inlined_call_operand.hbm [shape: bf16[256,256], index: 3, kind: input, shape index: {}]   ;;  %s1007_s4 = inlined_call_operand.vmem [shape: f32[1,256], index: 4, kind: input, shape index: {}]   ;;  %s1008_s5 = inlined_call_operand.vmem [shape: bf16[256,6], index: 5, kind: input, shape index: {}]   ;;  %s1009_s6 = inlined_call_operand.vmem [shape: f32[1,6], index: 6, kind: input, shape index: {}]   ;;  %s1010_s7 = inlined_call_operand.vmem [shape: f32[8,8], index: 7, kind: input, shape index: {}]   ;;  %s1011_s8 = inlined_call_operand.hbm [shape: f32[8,8], index: 8, kind: output, shape index: {}]  }
   0x1   :  { %14 = vsyncpa [#allocation4], 0  ;;  %s860_s27 = smov [#allocation2]  }
   0x2   :  { %s26_s28 = sshll.u32 %s860_s27, 4  ;;  %s27_s28 = int_to_ptr.vmem [resolvable:$true] %s26_s28 }
   0x3   :  { %s824_s29 = scalar_lea.vmem %s27_s28, 4096  ;;  %p829_p1 = scmp.lt.s32.totalorder %s27_s28, %s27_s28 }
   0x4   :  { %p825_p0 = scmp.ne.s32.totalorder %s27_s28, %s824_s29  ;;  %p830_p2 = scmp.lt.s32.totalorder %s824_s29, %s824_s29 }
   0x6   :  { %p831_p3 = por %p830_p2, %p829_p1 }
   0x8   :  { %p832_p4 = pnand %p831_p3, %p825_p0 }
   0xa   :  { %835 = shalt.err (!%p832_p4)
}
   0xb   :  { %s861_s30 = smov 128   ;;  %s862_s9 = smov 8  }
   0xc   :  { %32 = dma.hbm_to_vmem [thread:$0]  %s1006_s3, 4096, %s27_s28, [#allocation3], %s861_s30, %s861_s30, %s862_s9  }
   0xd   :  { %856 = dma.done.wait [#allocation3], 4096  }
   0xe   :  { %857 = vsyncadd [#allocation3], 4294963200  ;;  %v863_v0 = vmov 0   ;;  %v734_v1 = vld [vmem:[%s1004_s1 + $0x14] ss:$8 sps:$4 sm:$0xff]   ;;  %v45_v5 = vld [vmem:[%s1003_s0] sm:$0xff]  ;;  %v53_v51 = vlaneseq }
   0xf   :  { %119 = vmatprep.mubr.bf16.mxu0 %v863_v0  ;;  %v736_v2 = vld [vmem:[%s1004_s1 + $0x10] ss:$8 sps:$4 sm:$0xff]   ;;  %99 = vmatprep.subr.bf16.mxu0 %v734_v1  ;;  %v737_v3 = vld [vmem:[%s1004_s1 + $0x4] ss:$8 sps:$4 sm:$0xff]   ;;  %v739_v4 = vld [vmem:[%s1004_s1] ss:$8 sps:$4 sm:$0xff]   ;;  %v46_v9 = vpack.c.bf16 %v45_v5, %v45_v5 }
  0x10   :  { %100 = vmatpush1.bf16.msra.mxu0 %v736_v2  ;;  %v740_v6 = vld [vmem:[#allocation2 + $0x74] ss:$8 sps:$4 sm:$0xff]   ;;  %v742_v7 = vld [vmem:[#allocation2 + $0x70] ss:$8 sps:$4 sm:$0xff]   ;;  %v743_v8 = vld [vmem:[#allocation2 + $0x64] ss:$8 sps:$4 sm:$0xff]  }
  0x11   :  { %101 = vmatprep.subr.bf16.mxu0 %v737_v3  ;;  %336 = vmatprep.subr.bf16.mxu1 %v740_v6  ;;  %v745_v10 = vld [vmem:[#allocation2 + $0x60] ss:$8 sps:$4 sm:$0xff]   ;;  %vm83_vm0 = vcmask 261120   ;;  %v746_v11 = vld [vmem:[#allocation2 + $0x54] ss:$8 sps:$4 sm:$0xff]   ;;  %v54_v52 = vshrl.u32 %v53_v51, 7 }
  0x12   :  { %337 = vmatpush1.bf16.msra.mxu1 %v742_v7  ;;  %v748_v12 = vld [vmem:[#allocation2 + $0x50] ss:$8 sps:$4 sm:$0xff]   ;;  %v749_v13 = vld [vmem:[#allocation2 + $0x44] ss:$8 sps:$4 sm:$0xff]   ;;  %v751_v14 = vld [vmem:[#allocation2 + $0x40] ss:$8 sps:$4 sm:$0xff]  }
  0x13   :  { %338 = vmatprep.subr.bf16.mxu1 %v743_v8  ;;  %v752_v15 = vld [vmem:[#allocation2 + $0x34] ss:$8 sps:$4 sm:$0xff]   ;;  %v754_v16 = vld [vmem:[#allocation2 + $0x30] ss:$8 sps:$4 sm:$0xff]   ;;  %v755_v17 = vld [vmem:[#allocation2 + $0x24] ss:$8 sps:$4 sm:$0xff]  }
  0x14   :  { %102 = vmatpush1.bf16.msra.mxu0 %v739_v4  ;;  %v757_v18 = vld [vmem:[#allocation2 + $0x20] ss:$8 sps:$4 sm:$0xff]   ;;  %v758_v19 = vld [vmem:[#allocation2 + $0x14] ss:$8 sps:$4 sm:$0xff]   ;;  %v760_v20 = vld [vmem:[#allocation2 + $0x10] ss:$8 sps:$4 sm:$0xff]  }
  0x15   :  { %v761_v21 = vld [vmem:[#allocation2 + $0x4] ss:$8 sps:$4 sm:$0xff]   ;;  %v763_v22 = vld [vmem:[#allocation2] ss:$8 sps:$4 sm:$0xff]   ;;  %v764_v23 = vld [vmem:[#allocation2 + $0xf4] ss:$8 sps:$4 sm:$0xff]  }
  0x16   :  { %339 = vmatpush1.bf16.msra.mxu1 %v745_v10  ;;  %v766_v24 = vld [vmem:[#allocation2 + $0xf0] ss:$8 sps:$4 sm:$0xff]   ;;  %v767_v25 = vld [vmem:[#allocation2 + $0xe4] ss:$8 sps:$4 sm:$0xff]   ;;  %v769_v26 = vld [vmem:[#allocation2 + $0xe0] ss:$8 sps:$4 sm:$0xff]  }
  0x17   :  { %650 = vmatmul.mubr.msk.bf16.vlgmr.msra.gmra.mxu0 %vm83_vm0, %v46_v9  ;;  %340 = vmatprep.subr.bf16.mxu1 %v746_v11  ;;  %v770_v27 = vld [vmem:[#allocation2 + $0xd4] ss:$8 sps:$4 sm:$0xff]   ;;  %v772_v28 = vld [vmem:[#allocation2 + $0xd0] ss:$8 sps:$4 sm:$0xff]   ;;  %v773_v29 = vld [vmem:[#allocation2 + $0xc4] ss:$8 sps:$4 sm:$0xff]  }
  0x18   :  { %v775_v30 = vld [vmem:[#allocation2 + $0xc0] ss:$8 sps:$4 sm:$0xff]   ;;  %v776_v31 = vld [vmem:[#allocation2 + $0xb4] ss:$8 sps:$4 sm:$0xff]   ;;  %v778_v32 = vld [vmem:[#allocation2 + $0xb0] ss:$8 sps:$4 sm:$0xff]  }
  0x19   :  { %v779_v33 = vld [vmem:[#allocation2 + $0xa4] ss:$8 sps:$4 sm:$0xff]   ;;  %v781_v34 = vld [vmem:[#allocation2 + $0xa0] ss:$8 sps:$4 sm:$0xff]   ;;  %v782_v35 = vld [vmem:[#allocation2 + $0x94] ss:$8 sps:$4 sm:$0xff]  }
  0x1a   :  { %341 = vmatpush1.bf16.msra.mxu1 %v748_v12  ;;  %v784_v36 = vld [vmem:[#allocation2 + $0x90] ss:$8 sps:$4 sm:$0xff]   ;;  %v785_v37 = vld [vmem:[#allocation2 + $0x84] ss:$8 sps:$4 sm:$0xff]   ;;  %v787_v38 = vld [vmem:[#allocation2 + $0x80] ss:$8 sps:$4 sm:$0xff]  }
  0x1b   :  { %342 = vmatprep.subr.bf16.mxu1 %v749_v13  ;;  %v788_v39 = vld [vmem:[%s1008_s5 + $0x78] sm:$0xff]   ;;  %v790_v41 = vld [vmem:[%s1008_s5 + $0x70] sm:$0xff]   ;;  %v792_v43 = vld [vmem:[%s1008_s5 + $0x68] sm:$0xff]   ;;  %v55_v53 = vsub.s32 0, %v54_v52  ;;  %v59_v55 = vsub.s32 1, %v54_v52  ;;  %vm556_vm1 = vcmask 31744  }
  0x1c   :  { %v789_v40 = vld [vmem:[%s1008_s5 + $0x38] sm:$0xff]   ;;  %703 = vmatprep.subr.bf16.mxu0 %v788_v39  ;;  %v791_v42 = vld [vmem:[%s1008_s5 + $0x30] sm:$0xff]   ;;  %v793_v44 = vld [vmem:[%s1008_s5 + $0x28] sm:$0xff]   ;;  %vm612_vm3 = vcmask 15360   ;;  %vm621_vm5 = vcmask 7168   ;;  %vm625_vm6 = vcmask 39936  }
  0x1d   :  { %704 = vmatpush3.bf16.msra.mxu0 %v789_v40  ;;  %v794_v45 = vld [vmem:[%s1008_s5 + $0x60] sm:$0xff]   ;;  %v796_v47 = vld [vmem:[%s1008_s5 + $0x58] sm:$0xff]   ;;  %v798_v49 = vld [vmem:[%s1008_s5 + $0x50] sm:$0xff]   ;;  %s866_s9 = smov [#allocation5]   ;;  %vm627_vm7 = vcmask 48128   ;;  %vm629_vm8 = vcmask 64512  }
  0x1e   :  { %343 = vmatpush1.bf16.msra.mxu1 %v751_v14  ;;  %705 = vmatprep.subr.bf16.mxu0 %v790_v41  ;;  %v795_v46 = vld [vmem:[%s1008_s5 + $0x20] sm:$0xff]   ;;  %v797_v48 = vld [vmem:[%s1008_s5 + $0x18] sm:$0xff]   ;;  %v799_v50 = vld [vmem:[%s1008_s5 + $0x10] sm:$0xff]   ;;  %s637_s10 = sshll.u32 %s866_s9, 4  ;;  %s638_s10 = int_to_ptr.vmem [resolvable:$true] %s637_s10 }
  0x1f   :  { %344 = vmatprep.subr.bf16.mxu1 %v752_v15  ;;  %v51_v54 = vld [vmem:[%s1005_s2] sm:$0x3]  ;;  %v800_v4 = vld [vmem:[%s1008_s5 + $0x48] sm:$0xff]   ;;  %s836_s11 = scalar_lea.vmem %s638_s10, 128  ;;  %p841_p6 = scmp.lt.s32.totalorder %s638_s10, %s638_s10 }
  0x20   :  { %v56_v56 = vrot.slane %v51_v54, %v55_v53  ;;  %v60_v57 = vrot.slane %v51_v54, %v59_v55  ;;  %v801_v5 = vld [vmem:[%s1008_s5 + $0x8] sm:$0xff]   ;;  %v802_v6 = vld [vmem:[%s1008_s5 + $0x40] sm:$0xff]   ;;  %p837_p5 = scmp.ne.s32.totalorder %s638_s10, %s836_s11  ;;  %p842_p7 = scmp.lt.s32.totalorder %s836_s11, %s836_s11 }
  0x21   :  { %706 = vmatpush3.bf16.msra.mxu0 %v791_v42  ;;  %v803_v7 = vld [vmem:[%s1008_s5] sm:$0xff]  }
  0x22   :  { %345 = vmatpush1.bf16.msra.mxu1 %v754_v16  ;;  %707 = vmatprep.subr.bf16.mxu0 %v792_v43  ;;  %v164_v8 = vld [vmem:[%s1007_s4] sm:$0x3]  ;;  %p843_p8 = por %p842_p7, %p841_p6 }
  0x23   :  { %346 = vmatprep.subr.bf16.mxu1 %v755_v17  ;;  %v169_v9 = vrot.slane %v164_v8, %v55_v53  ;;  %v173_v10 = vrot.slane %v164_v8, %v59_v55 }
  0x24   :  { %p844_p9 = pnand %p843_p8, %p837_p5 }
  0x25   :  { %708 = vmatpush3.bf16.msra.mxu0 %v793_v44 }
  0x26   :  { %347 = vmatpush1.bf16.msra.mxu1 %v757_v18  ;;  %709 = vmatprep.subr.bf16.mxu0 %v794_v45 }
  0x27   :  { %348 = vmatprep.subr.bf16.mxu1 %v758_v19 }
  0x29   :  { %710 = vmatpush3.bf16.msra.mxu0 %v795_v46 }
  0x2a   :  { %349 = vmatpush1.bf16.msra.mxu1 %v760_v20  ;;  %711 = vmatprep.subr.bf16.mxu0 %v796_v47  ;;  %v581_v47 = vand.u32 127, %v53_v51 }
  0x2b   :  { %350 = vmatprep.subr.bf16.mxu1 %v761_v21  ;;  %v569_v21 = vld [vmem:[%s1010_s7] sm:$0xff]  ;;  %s865_s7 = smov 126  }
  0x2c   :  { %804 = vlog2.f32 %v569_v21 }
  0x2d   :  { %712 = vmatpush3.bf16.msra.mxu0 %v797_v48 }
  0x2e   :  { %351 = vmatpush1.bf16.msra.mxu1 %v763_v22  ;;  %713 = vmatprep.subr.bf16.mxu0 %v798_v49  ;;  %v583_v49 = vcvt.s32.f32 %v581_v47 }
  0x2f   :  { %352 = vmatprep.subr.bf16.mxu1 %v764_v23 }
  0x31   :  { %714 = vmatpush3.bf16.msra.mxu0 %v799_v50 }
  0x32   :  { %353 = vmatpush2.bf16.msra.mxu1 %v766_v24  ;;  %715 = vmatprep.subr.bf16.mxu0 %v800_v4 }
  0x33   :  { %354 = vmatprep.subr.bf16.mxu1 %v767_v25 }
  0x35   :  { %716 = vmatpush3.bf16.msra.mxu0 %v801_v5 }
  0x36   :  { %355 = vmatpush2.bf16.msra.mxu1 %v769_v26  ;;  %717 = vmatprep.subr.bf16.mxu0 %v802_v6 }
  0x37   :  { %356 = vmatprep.subr.bf16.mxu1 %v770_v27 }
  0x39   :  { %718 = vmatpush3.bf16.msra.mxu0 %v803_v7  ;;  %v805_v22 = vpop.eup %804 }
  0x3a   :  { %357 = vmatpush2.bf16.msra.mxu1 %v772_v28  ;;  %v571_v23 = vmul.f32 0.6931472, %v805_v22  ;;  %v683_v28 = vld [vmem:[%s1009_s6] ss:$0 sm:$0xff]  ;;  %s864_s6 = smov 124  }
  0x3b   :  { %358 = vmatprep.subr.bf16.mxu1 %v773_v29 }
  0x3c   :  { %v572_v24 = vsub.f32 0.0, %v571_v23 }
  0x3e   :  { %359 = vmatpush2.bf16.msra.mxu1 %v775_v30  ;;  %806 = vlog2.f32 %v572_v24 }
  0x3f   :  { %360 = vmatprep.subr.bf16.mxu1 %v776_v31 }
  0x42   :  { %361 = vmatpush2.bf16.msra.mxu1 %v778_v32 }
  0x43   :  { %362 = vmatprep.subr.bf16.mxu1 %v779_v33 }
  0x46   :  { %363 = vmatpush2.bf16.msra.mxu1 %v781_v34 }
  0x47   :  { %364 = vmatprep.subr.bf16.mxu1 %v782_v35 }
  0x4a   :  { %365 = vmatpush2.bf16.msra.mxu1 %v784_v36 }
  0x4b   :  { %366 = vmatprep.subr.bf16.mxu1 %v785_v37  ;;  %v807_v25 = vpop.eup %806 }
  0x4c   :  { %v574_v26 = vmul.f32 0.6931472, %v807_v25 }
  0x4e   :  { %367 = vmatpush2.bf16.msra.mxu1 %v787_v38  ;;  %v575_v31 = vsub.f32 0.0, %v574_v26  ;;  %v601_v38 = vmul.f32 2.0, %v569_v21 }
  0x50   :  { %v701_v39 = vadd.f32 -1.0, %v601_v38 }
  0x52   :  { %v603_v40 = vmul.f32 0.5, %v701_v39 }
  0x54   :  { %v605_v41 = vmul.f32 %v603_v40, %v603_v40 }
  0x56   :  { %v606_v42 = vmul.f32 -6.0, %v605_v41 }
  0x58   :  { %v702_v43 = vadd.f32 -0.54930615, %v606_v42 }
  0xd7   :  { %v121_v58 = vpop.f32.mrf.mxu0 }
  0xd8   :  { %v122_v59 = vadd.f32 %v121_v58, %v56_v56 }
  0xd9   :  { %v123_v60 = vpop.f32.mrf.mxu0 }
  0xda   :  { %v124_v61 = vadd.f32 %v123_v60, %v60_v57  ;;  %v128_v62 = vmax.f32 %v122_v59, 0.0 }
  0xdb   :  { %v125_v63 = vpop.f32.mrf.mxu0 }
  0xdc   :  { %v129_v0 = vmax.f32 %v124_v61, 0.0  ;;  %v130_v3 = vpack.c.bf16 %v128_v62, %v128_v62 }
  0xdd   :  { %v126_v1 = vpop.f32.mrf.mxu0 }
  0xde   :  { %v131_v2 = vpack.c.bf16 %v129_v0, %v129_v0 }
  0xe0   :  { %368 = vmatprep.mubr.bf16.mxu1 %v131_v2 }
  0xe1   :  { %369 = vmatmul.mubr.bf16.vlgmr.msra.gmra.mxu1 %v130_v3 }
 0x1a1   :  { %v370_v11 = vpop.f32.mrf.mxu1 }
 0x1a2   :  { %v371_v12 = vadd.f32 %v370_v11, %v169_v9 }
 0x1a3   :  { %v372_v13 = vpop.f32.mrf.mxu1 }
 0x1a4   :  { %v373_v14 = vadd.f32 %v372_v13, %v173_v10  ;;  %v377_v15 = vmax.f32 %v371_v12, 0.0 }
 0x1a5   :  { %v374_v16 = vpop.f32.mrf.mxu1 }
 0x1a6   :  { %v378_v17 = vmax.f32 %v373_v14, 0.0  ;;  %v379_v20 = vpack.c.bf16 %v377_v15, %v377_v15 }
 0x1a7   :  { %v375_v18 = vpop.f32.mrf.mxu1 }
 0x1a8   :  { %v380_v19 = vpack.c.bf16 %v378_v17, %v378_v17 }
 0x1aa   :  { %548 = vmatprep.mubr.bf16.mxu0 %v380_v19 }
 0x1ab   :  { %549 = vmatmul.mubr.bf16.vlgmr.msra.gmra.mxu0 %v379_v20 }
 0x26b   :  { %v719_v27 = vpop.f32.mrf.mxu0 }
 0x26d   :  { %v720_v29 = vpop.f32.mrf.mxu0 }
 0x26e   :  { %v721_v30 = vadd.f32 %v720_v29, %v719_v27 }
 0x26f   :  { %v722_v32 = vpop.f32.mrf.mxu0 }
 0x270   :  { %v551_v33 = vadd.f32 %v721_v30, %v683_v28 }
 0x271   :  { %v723_v34 = vpop.f32.mrf.mxu0 }
 0x272   :  { %v557_v35 = vsel %vm556_vm1, %v551_v33, -inf  ;;  %v576_v36 = vadd.f32 %v575_v31, %v551_v33  ;;  %v700_v57 = vmul.f32 -1.442695, %v551_v33 }
 0x273   :  { %558 = vmax.xlane.f32.xlu0 %v557_v35 }
 0x274   :  { %v577_v37 = vsel %vm556_vm1, %v576_v36, -inf }
 0x277   :  { %578 = vmax.xlane.f32.xlu0 %v577_v37 }
 0x28d   :  { %609 = vrot.lane.b32.xlu0 %v702_v43, %s864_s6 }
 0x2fc   :  { %v559_v44 = vpop.xlane.xlu0 %558 }
 0x2fd   :  { %v560_v45 = vsub.f32 %v551_v33, %v559_v44 }
 0x2ff   :  { %v561_v46 = vmul.f32 1.442695, %v560_v45 }
 0x300   :  { %v579_v48 = vpop.xlane.xlu0 %578 }
 0x301   :  { %808 = vpow2.f32 %v561_v46  ;;  %vm582_vm2 = vcmp.ge.f32.partialorder %v576_v36, %v579_v48 }
 0x302   :  { %v584_v53 = vsel %vm582_vm2, %v583_v49, 4.0  ;;  %810 = vpow2.f32 %v700_v57 }
 0x303   :  { %v585_v54 = vsel %vm556_vm1, %v584_v53, inf }
 0x304   :  { %v610_v55 = vpop.permute.xlu0 %609 }
 0x305   :  { %v613_v56 = vsel %vm612_vm3, %v610_v55, 0.0 }
 0x30e   :  { %v809_v50 = vpop.eup %808 }
 0x30f   :  { %v563_v52 = vsel %vm556_vm1, %v809_v50, 0.0  ;;  %v811_v59 = vpop.eup %810 }
 0x310   :  { %564 = vadd.xlane.f32.xlu1 %v563_v52  ;;  %v597_v61 = vadd.f32 1.0, %v811_v59 }
 0x314   :  { %586 = vmin.xlane.f32.xlu1 %v585_v54 }
 0x318   :  { %614 = vadd.xlane.f32.xlu1 %v613_v56 }
 0x399   :  { %v565_v58 = vpop.xlane.xlu1 %564 }
 0x39a   :  { %812 = vlog2.f32 %v565_v58 }
 0x39b   :  { %814 = vrcp.f32 %v597_v61 }
 0x39d   :  { %v587_v51 = vpop.xlane.xlu1 %586 }
 0x39e   :  { %v725_v60 = vtrunc.f32 %v587_v51 }
 0x3a0   :  { %v726_v63 = vcvt.f32.s32 %v725_v60 }
 0x3a1   :  { %v615_v7 = vpop.xlane.xlu1 %614 }
 0x3a2   :  { %vm589_vm4 = vcmp.eq.s32.totalorder %v581_v47, %v726_v63 }
 0x3a7   :  { %v813_v62 = vpop.eup %812 }
 0x3a8   :  { %v567_v0 = vmul.f32 0.6931472, %v813_v62  ;;  %v815_v4 = vpop.eup %814 }
 0x3a9   :  { %v600_v5 = vmul.f32 16.0, %v815_v4 }
 0x3aa   :  { %v568_v1 = vsub.f32 %v560_v45, %v567_v0 }
 0x3ab   :  { %v604_v6 = vadd.f32 %v603_v40, %v600_v5 }
 0x3ac   :  { %v590_v2 = vsel %vm589_vm4, %v568_v1, 0.0 }
 0x3ad   :  { %v591_v3 = vsel %vm556_vm1, %v590_v2, 0.0 }
 0x3ae   :  { %592 = vadd.xlane.f32.xlu1 %v591_v3 }
 0x3bf   :  { %618 = vrot.lane.b32.xlu1 %v604_v6, %s865_s7 }
 0x437   :  { %v593_v8 = vpop.xlane.xlu1 %592 }
 0x438   :  { %v622_v9 = vsel %vm621_vm5, %v587_v51, %v593_v8  ;;  %v616_v11 = vadd.f32 %v615_v7, %v593_v8 }
 0x43b   :  { %v619_v10 = vpop.permute.xlu1 %618 }
 0x43c   :  { %v623_v12 = vsel %vm612_vm3, %v622_v9, %v619_v10 }
 0x43d   :  { %v624_v13 = vsel %vm556_vm1, %v623_v12, %v615_v7 }
 0x43e   :  { %v626_v14 = vsel %vm625_vm6, %v624_v13, %v616_v11 }
 0x43f   :  { %v628_v15 = vsel %vm627_vm7, %v626_v14, 0.0 }
 0x440   :  { %630 = vst.msk [vmem:[#allocation5] sm:$0xff] %vm629_vm8, %v628_v15 }
 0x441   :  { %847 = shalt.err (!%p844_p9)
}
 0x442   :  { %640 = dma.vmem_to_hbm [thread:$0]  %s638_s10, 128, %s1011_s8, [#allocation4]  }
 0x443   :  { %858 = dma.done.wait [#allocation4], 128  }
 0x444   :  { %859 = vsyncadd [#allocation4], 4294967168 }
 0x445   :  { %644 = vsyncpa [#allocation3], 1 }
 0x446   :  { %645 = vsyncpa [#allocation4], 1 }

</bundles_post_ra>
